<compile_context>
chip_gen: v7x
topology: tpu7x:2x2x1
jax: 0.10.0
libtpu: 0.0.40
codegen_flags: <defaults>
</compile_context>

<pallas_src>
import functools

import jax
import jax.numpy as jnp
from jax.experimental import pallas as pl
from jax.experimental.pallas import tpu as pltpu


def _round_up(x, m):
    return ((x + m - 1) // m) * m


def _vmem_capacity_bytes():
    """Per-core VMEM capacity; conservative 64 MiB (v7x) fallback."""
    try:
        info = pltpu.get_tpu_info()
        for attr in ("vmem_capacity_bytes", "vmem_size_bytes", "vmem_bytes"):
            v = getattr(info, attr, None)
            if v:
                return int(v)
    except Exception:
        pass
    return 64 << 20


def _topk_ce_kernel(x_ref, lbl_ref, o_ref, *, p_k, inv_tau, tb, b_actual,
                    ew_dtype):
    """One batch tile of (tb, N); writes a lane-dense (1, 8, 128) partial sum."""
    x = x_ref[...].astype(jnp.float32)                        # (tb, N)
    N = x.shape[-1]
    k = len(p_k)

    # (1, N) int32 class ids; compares broadcast across sublanes (no (tb, N)
    # iota buffers).
    iota = jax.lax.broadcasted_iota(jnp.int32, (1, N), 1)
    lbl = lbl_ref[...]                                        # (tb, 1) int32

    # x at the label: masked select + row reduce (single full-tile pass).
    x_lbl = jnp.sum(jnp.where(iota == lbl, x, 0.0), axis=-1, keepdims=True)

    # --- top-k values per row (descending), iterative max extraction -------
    # First-occurrence (int32) tie masking matches torch.sort tie order;
    # masking all max-equal elements would be wrong for duplicated maxima.
    work = x
    topvals = []
    for _ in range(k):
        m = jnp.max(work, axis=-1, keepdims=True)             # (tb, 1)
        topvals.append(m)
        first_idx = jnp.min(jnp.where(work == m, iota, N),
                            axis=-1, keepdims=True)           # (tb, 1) int32
        work = jnp.where(iota == first_idx, -jnp.inf, work)

    # --- softmax(outputs) term at the label (top1_mode == 'sm') ------------
    xm = topvals[0]                                           # row max (reused)
    x_e = x.astype(ew_dtype)                                  # bf16 opt on v6e/v7x
    den_sm = jnp.sum(jnp.exp(x_e - xm.astype(ew_dtype)),
                     axis=-1, keepdims=True, dtype=jnp.float32)
    num_sm = jnp.exp(x_lbl - xm)                              # (tb, 1) f32
    dist_lbl = p_k[0] * num_sm * pl.reciprocal(den_sm)        # exact reciprocal

    # --- SoftSort top-k columns, evaluated only at the label ----------------
    # Column c uses pivot t = (k - c)-th largest row value; t is an element of
    # the row, so max_j(-|x - t|*inv_tau) == 0 and no stabilization is needed.
    # Temperature scaling is hoisted out of the loop.
    x_s = (x * inv_tau).astype(ew_dtype)                      # (tb, N)
    x_lbl_s = x_lbl * inv_tau                                 # (tb, 1) f32
    for c in range(k):
        # Static column weight from folding the nested p_k windows.
        w_c = sum(p_k[idx] for idx in range(max(1, k - 1 - c), k))
        t_s = topvals[k - 1 - c] * inv_tau                    # (tb, 1) f32
        den = jnp.sum(jnp.exp(-jnp.abs(x_s - t_s.astype(ew_dtype))),
                      axis=-1, keepdims=True, dtype=jnp.float32)
        num = jnp.exp(-jnp.abs(x_lbl_s - t_s))                # (tb, 1) f32
        dist_lbl = dist_lbl + w_c * num * pl.reciprocal(den)

    # --- per-row NLL, masked to valid (non-padded) rows, partial sum --------
    logd = jnp.log(dist_lbl * (1.0 - 2e-7) + 1e-7)            # (tb, 1)
    row = pl.program_id(0) * tb + jax.lax.broadcasted_iota(jnp.int32, (tb, 1), 0)
    valid = (row < b_actual).astype(jnp.float32)
    partial = -jnp.sum(logd * valid)

    # Lane-dense unmasked store; consumed as out[:, 0, 0] outside the kernel.
    o_ref[...] = jnp.broadcast_to(partial, o_ref.shape).astype(jnp.float32)


def topk_cross_entropy_loss(outputs, labels, p_k, inverse_temperature, *,
                            max_block_rows=512,
                            elementwise_dtype=jnp.float32):
    """outputs: (B, N), labels: (B,) int -> scalar float32 loss.

    elementwise_dtype=jnp.bfloat16 halves the full-tile exp/abs/sub cost on
    v6e/v7x (bf16-native VPU/EUP); keep f32 on v5e or when rtol=1e-4 accuracy
    vs. the f32 reference is required.
    """
    assert 0.9999 < sum(p_k) < 1.0001, p_k
    B, N = outputs.shape
    in_bytes = jnp.dtype(outputs.dtype).itemsize
    ew_bytes = jnp.dtype(elementwise_dtype).itemsize

    # --- VMEM-aware batch-tile sizing ---------------------------------------
    vmem_cap = _vmem_capacity_bytes()
    vmem_budget = int(vmem_cap * 0.6)      # headroom for compiler scratch etc.
    # Peak live VMEM per batch row:
    #   2 x N x in_bytes          double-buffered input block
    # + ~4 x N x 4 B              f32 x / work / compare temporaries
    # + ~2 x N x ew_bytes         elementwise exp operands (f32 or bf16)
    per_row = 2 * N * in_bytes + 4 * N * 4 + 2 * N * ew_bytes
    tb = (vmem_budget // per_row) // 8 * 8
    tb = int(max(8, min(tb, max_block_rows, _round_up(B, 8))))

    # >= 2 grid steps whenever the batch allows it: keeps both v7x TensorCores
    # busy under the "parallel" batch axis and lets the input DMA pipeline.
    b_pad8 = _round_up(B, 8)
    if b_pad8 > 8 and b_pad8 <= tb:
        tb = _round_up(-(-b_pad8 // 2), 8)

    b_pad = _round_up(B, tb)
    if b_pad != B:
        outputs = jnp.pad(outputs, ((0, b_pad - B), (0, 0)))
        labels = jnp.pad(labels, ((0, b_pad - B),))
    labels2d = labels.reshape(b_pad, 1).astype(jnp.int32)
    num_tiles = b_pad // tb

    est_bytes = tb * per_row + 2 * (8 * 128 * 4) + (1 << 20)
    vmem_limit = int(min(vmem_cap - (2 << 20), max(32 << 20, 2 * est_bytes)))

    kern = functools.partial(
        _topk_ce_kernel,
        p_k=tuple(float(p) for p in p_k),
        inv_tau=float(inverse_temperature),
        tb=tb,
        b_actual=B,
        ew_dtype=elementwise_dtype,
    )
    # Note: no f32 cast here; kernel casts internally (keeps bf16 HBM reads).
    partials = pl.pallas_call(
        kern,
        grid=(num_tiles,),
        out_shape=jax.ShapeDtypeStruct((num_tiles, 8, 128), jnp.float32),
        in_specs=[
            pl.BlockSpec((tb, N), lambda i: (i, 0)),
            pl.BlockSpec((tb, 1), lambda i: (i, 0)),
        ],
        out_specs=pl.BlockSpec((1, 8, 128), lambda i: (i, 0, 0)),
        compiler_params=pltpu.CompilerParams(
            dimension_semantics=("parallel",),
            vmem_limit_bytes=vmem_limit),
    )(outputs, labels2d)
    return jnp.sum(partials[:, 0, 0]) / float(B)


def _reference_loss(outputs, labels, p_k, inverse_temperature):
    """Pure-JAX transcription of the PyTorch forward (softsort / 'sm' / m=None)."""
    tau = 1.0 / float(inverse_temperature)
    k = len(p_k)
    x = outputs.astype(jnp.float32)
    B, N = x.shape
    neg = -x
    sorted_desc = -jnp.sort(x, axis=-1)                      # sort(-x, descending)
    pairwise = -jnp.abs(neg[:, None, :] - sorted_desc[:, :, None]) / tau
    P = jax.nn.softmax(pairwise, axis=-1)                    # SoftSort(-x): (B, n, n)
    X = jnp.swapaxes(P, -2, -1)                              # .transpose(-2, -1)
    P_topk = X[:, :, -k:]
    dist = p_k[0] * jax.nn.softmax(x, axis=-1)
    for idx, p in enumerate(p_k[1:]):
        kk = idx + 2
        dist = dist + p * P_topk[:, :, -kk:].sum(-1)
    logd = jnp.log(dist * (1.0 - 2e-7) + 1e-7)
    nll = -logd[jnp.arange(B), labels]
    return nll.mean()


if __name__ == "__main__":
    # Deterministic config / inputs
    p_k = [0.5, 0.3, 0.2]            # k = 3, sums to 1
    inverse_temperature = 2.0
    B, N = 8, 128                    # batch, num classes (n)

    key = jax.random.PRNGKey(0)
    k_out, k_lbl, k_out2, k_lbl2 = jax.random.split(key, 4)
    outputs = jax.random.normal(k_out, (B, N), dtype=jnp.float32)
    labels = jax.random.randint(k_lbl, (B,), 0, N, dtype=jnp.int32)

    loss = topk_cross_entropy_loss(outputs, labels, p_k, inverse_temperature)
    loss = jax.block_until_ready(loss)
    ref = _reference_loss(outputs, labels, p_k, inverse_temperature)
    assert jnp.allclose(loss, ref, rtol=1e-4, atol=1e-5), (loss, ref)

    # Second check: batch not a multiple of the tile (exercises pad + mask and
    # the >=2-tile split path).
    B2 = 10
    outputs2 = jax.random.normal(k_out2, (B2, N), dtype=jnp.float32)
    labels2 = jax.random.randint(k_lbl2, (B2,), 0, N, dtype=jnp.int32)
    loss2 = topk_cross_entropy_loss(outputs2, labels2, p_k, inverse_temperature)
    loss2 = jax.block_until_ready(loss2)
    ref2 = _reference_loss(outputs2, labels2, p_k, inverse_temperature)
    assert jnp.allclose(loss2, ref2, rtol=1e-4, atol=1e-5), (loss2, ref2)

    print("KERNEL_OK")
</pallas_src>

<mosaic_0001>
module attributes {stable_mosaic.version = 11 : i64} {
  func.func @_topk_ce_kernel(%arg0: i32, %arg1: memref<8x128xf32, #tpu.memory_space<vmem>>, %arg2: memref<8x1xi32, #tpu.memory_space<vmem>>, %arg3: memref<1x8x128xf32, #tpu.memory_space<vmem>>) attributes {dimension_semantics = [#tpu.dimension_semantics<parallel>], iteration_bounds = array<i64: 1>, scalar_prefetch = 0 : i64, scratch_operands = 0 : i64, tpu.core_type = #tpu.core_type<tc>, window_params = [{transform_indices = @transform_0, window_bounds = array<i64: 8, 128>}, {transform_indices = @transform_1, window_bounds = array<i64: 8, 1>}, {transform_indices = @transform_2, window_bounds = array<i64: 1, 8, 128>}]} {
    %c0 = arith.constant 0 : index
    %c0_0 = arith.constant 0 : index
    %0 = vector.load %arg1[%c0, %c0_0] : memref<8x128xf32, #tpu.memory_space<vmem>>, vector<8x128xf32>
    %1 = tpu.iota {dimensions = array<i32: 1>} : vector<1x128xi32>
    %c0_1 = arith.constant 0 : index
    %c0_2 = arith.constant 0 : index
    %2 = vector.load %arg2[%c0_1, %c0_2] : memref<8x1xi32, #tpu.memory_space<vmem>>, vector<8x1xi32>
    %3 = vector.broadcast %1 : vector<1x128xi32> to vector<8x128xi32>
    %4 = vector.broadcast %2 : vector<8x1xi32> to vector<8x128xi32>
    %5 = arith.cmpi eq, %3, %4 : vector<8x128xi32>
    %cst = arith.constant 0.000000e+00 : f32
    %6 = vector.broadcast %cst : f32 to vector<8x128xf32>
    %7 = arith.select %5, %0, %6 : vector<8x128xi1>, vector<8x128xf32>
    %cst_3 = arith.constant dense<0.000000e+00> : vector<8xf32>
    %8 = vector.multi_reduction <add>, %7, %cst_3 [1] : vector<8x128xf32> to vector<8xf32>
    %9 = vector.shape_cast %8 : vector<8xf32> to vector<8x1xf32>
    %cst_4 = arith.constant dense<0xFF800000> : vector<8xf32>
    %10 = vector.multi_reduction <maximumf>, %0, %cst_4 [1] : vector<8x128xf32> to vector<8xf32>
    %11 = vector.shape_cast %10 : vector<8xf32> to vector<8x1xf32>
    %12 = vector.broadcast %11 : vector<8x1xf32> to vector<8x128xf32>
    %13 = arith.cmpf oeq, %0, %12 : vector<8x128xf32>
    %c128_i32 = arith.constant 128 : i32
    %14 = vector.shape_cast %1 : vector<1x128xi32> to vector<1x128xi32>
    %15 = vector.broadcast %14 : vector<1x128xi32> to vector<8x128xi32>
    %16 = vector.broadcast %c128_i32 : i32 to vector<8x128xi32>
    %17 = arith.select %13, %15, %16 : vector<8x128xi1>, vector<8x128xi32>
    %cst_5 = arith.constant dense<2147483647> : vector<8xi32>
    %18 = vector.multi_reduction <minsi>, %17, %cst_5 [1] : vector<8x128xi32> to vector<8xi32>
    %19 = vector.shape_cast %18 : vector<8xi32> to vector<8x1xi32>
    %20 = vector.broadcast %1 : vector<1x128xi32> to vector<8x128xi32>
    %21 = vector.broadcast %19 : vector<8x1xi32> to vector<8x128xi32>
    %22 = arith.cmpi eq, %20, %21 : vector<8x128xi32>
    %cst_6 = arith.constant 0xFF800000 : f32
    %23 = vector.broadcast %cst_6 : f32 to vector<8x128xf32>
    %24 = arith.select %22, %23, %0 : vector<8x128xi1>, vector<8x128xf32>
    %cst_7 = arith.constant dense<0xFF800000> : vector<8xf32>
    %25 = vector.multi_reduction <maximumf>, %24, %cst_7 [1] : vector<8x128xf32> to vector<8xf32>
    %26 = vector.shape_cast %25 : vector<8xf32> to vector<8x1xf32>
    %27 = vector.broadcast %26 : vector<8x1xf32> to vector<8x128xf32>
    %28 = arith.cmpf oeq, %24, %27 : vector<8x128xf32>
    %c128_i32_8 = arith.constant 128 : i32
    %29 = vector.shape_cast %1 : vector<1x128xi32> to vector<1x128xi32>
    %30 = vector.broadcast %29 : vector<1x128xi32> to vector<8x128xi32>
    %31 = vector.broadcast %c128_i32_8 : i32 to vector<8x128xi32>
    %32 = arith.select %28, %30, %31 : vector<8x128xi1>, vector<8x128xi32>
    %cst_9 = arith.constant dense<2147483647> : vector<8xi32>
    %33 = vector.multi_reduction <minsi>, %32, %cst_9 [1] : vector<8x128xi32> to vector<8xi32>
    %34 = vector.shape_cast %33 : vector<8xi32> to vector<8x1xi32>
    %35 = vector.broadcast %1 : vector<1x128xi32> to vector<8x128xi32>
    %36 = vector.broadcast %34 : vector<8x1xi32> to vector<8x128xi32>
    %37 = arith.cmpi eq, %35, %36 : vector<8x128xi32>
    %cst_10 = arith.constant 0xFF800000 : f32
    %38 = vector.broadcast %cst_10 : f32 to vector<8x128xf32>
    %39 = arith.select %37, %38, %24 : vector<8x128xi1>, vector<8x128xf32>
    %cst_11 = arith.constant dense<0xFF800000> : vector<8xf32>
    %40 = vector.multi_reduction <maximumf>, %39, %cst_11 [1] : vector<8x128xf32> to vector<8xf32>
    %41 = vector.shape_cast %40 : vector<8xf32> to vector<8x1xf32>
    %42 = vector.broadcast %11 : vector<8x1xf32> to vector<8x128xf32>
    %43 = arith.subf %0, %42 : vector<8x128xf32>
    %44 = math.exp %43 : vector<8x128xf32>
    %cst_12 = arith.constant dense<0.000000e+00> : vector<8xf32>
    %45 = vector.multi_reduction <add>, %44, %cst_12 [1] : vector<8x128xf32> to vector<8xf32>
    %46 = vector.shape_cast %45 : vector<8xf32> to vector<8x1xf32>
    %47 = arith.subf %9, %11 : vector<8x1xf32>
    %48 = math.exp %47 : vector<8x1xf32>
    %cst_13 = arith.constant 5.000000e-01 : f32
    %49 = vector.broadcast %cst_13 : f32 to vector<8x1xf32>
    %50 = arith.mulf %49, %48 : vector<8x1xf32>
    %51 = tpu.reciprocal %46 : vector<8x1xf32> -> vector<8x1xf32>
    %52 = arith.mulf %50, %51 : vector<8x1xf32>
    %cst_14 = arith.constant 2.000000e+00 : f32
    %53 = vector.broadcast %cst_14 : f32 to vector<8x128xf32>
    %54 = arith.mulf %0, %53 : vector<8x128xf32>
    %cst_15 = arith.constant 2.000000e+00 : f32
    %55 = vector.broadcast %cst_15 : f32 to vector<8x1xf32>
    %56 = arith.mulf %9, %55 : vector<8x1xf32>
    %cst_16 = arith.constant 2.000000e+00 : f32
    %57 = vector.broadcast %cst_16 : f32 to vector<8x1xf32>
    %58 = arith.mulf %41, %57 : vector<8x1xf32>
    %59 = vector.broadcast %58 : vector<8x1xf32> to vector<8x128xf32>
    %60 = arith.subf %54, %59 : vector<8x128xf32>
    %61 = math.absf %60 : vector<8x128xf32>
    %cst_17 = arith.constant 0.000000e+00 : f32
    %62 = vector.broadcast %cst_17 : f32 to vector<8x128xf32>
    %63 = arith.subf %62, %61 : vector<8x128xf32>
    %64 = math.exp %63 : vector<8x128xf32>
    %cst_18 = arith.constant dense<0.000000e+00> : vector<8xf32>
    %65 = vector.multi_reduction <add>, %64, %cst_18 [1] : vector<8x128xf32> to vector<8xf32>
    %66 = vector.shape_cast %65 : vector<8xf32> to vector<8x1xf32>
    %67 = arith.subf %56, %58 : vector<8x1xf32>
    %68 = math.absf %67 : vector<8x1xf32>
    %cst_19 = arith.constant 0.000000e+00 : f32
    %69 = vector.broadcast %cst_19 : f32 to vector<8x1xf32>
    %70 = arith.subf %69, %68 : vector<8x1xf32>
    %71 = math.exp %70 : vector<8x1xf32>
    %cst_20 = arith.constant 2.000000e-01 : f32
    %72 = vector.broadcast %cst_20 : f32 to vector<8x1xf32>
    %73 = arith.mulf %72, %71 : vector<8x1xf32>
    %74 = tpu.reciprocal %66 : vector<8x1xf32> -> vector<8x1xf32>
    %75 = arith.mulf %73, %74 : vector<8x1xf32>
    %76 = arith.addf %52, %75 : vector<8x1xf32>
    %cst_21 = arith.constant 2.000000e+00 : f32
    %77 = vector.broadcast %cst_21 : f32 to vector<8x1xf32>
    %78 = arith.mulf %26, %77 : vector<8x1xf32>
    %79 = vector.broadcast %78 : vector<8x1xf32> to vector<8x128xf32>
    %80 = arith.subf %54, %79 : vector<8x128xf32>
    %81 = math.absf %80 : vector<8x128xf32>
    %cst_22 = arith.constant 0.000000e+00 : f32
    %82 = vector.broadcast %cst_22 : f32 to vector<8x128xf32>
    %83 = arith.subf %82, %81 : vector<8x128xf32>
    %84 = math.exp %83 : vector<8x128xf32>
    %cst_23 = arith.constant dense<0.000000e+00> : vector<8xf32>
    %85 = vector.multi_reduction <add>, %84, %cst_23 [1] : vector<8x128xf32> to vector<8xf32>
    %86 = vector.shape_cast %85 : vector<8xf32> to vector<8x1xf32>
    %87 = arith.subf %56, %78 : vector<8x1xf32>
    %88 = math.absf %87 : vector<8x1xf32>
    %cst_24 = arith.constant 0.000000e+00 : f32
    %89 = vector.broadcast %cst_24 : f32 to vector<8x1xf32>
    %90 = arith.subf %89, %88 : vector<8x1xf32>
    %91 = math.exp %90 : vector<8x1xf32>
    %cst_25 = arith.constant 5.000000e-01 : f32
    %92 = vector.broadcast %cst_25 : f32 to vector<8x1xf32>
    %93 = arith.mulf %92, %91 : vector<8x1xf32>
    %94 = tpu.reciprocal %86 : vector<8x1xf32> -> vector<8x1xf32>
    %95 = arith.mulf %93, %94 : vector<8x1xf32>
    %96 = arith.addf %76, %95 : vector<8x1xf32>
    %cst_26 = arith.constant 2.000000e+00 : f32
    %97 = vector.broadcast %cst_26 : f32 to vector<8x1xf32>
    %98 = arith.mulf %11, %97 : vector<8x1xf32>
    %99 = vector.broadcast %98 : vector<8x1xf32> to vector<8x128xf32>
    %100 = arith.subf %54, %99 : vector<8x128xf32>
    %101 = math.absf %100 : vector<8x128xf32>
    %cst_27 = arith.constant 0.000000e+00 : f32
    %102 = vector.broadcast %cst_27 : f32 to vector<8x128xf32>
    %103 = arith.subf %102, %101 : vector<8x128xf32>
    %104 = math.exp %103 : vector<8x128xf32>
    %cst_28 = arith.constant dense<0.000000e+00> : vector<8xf32>
    %105 = vector.multi_reduction <add>, %104, %cst_28 [1] : vector<8x128xf32> to vector<8xf32>
    %106 = vector.shape_cast %105 : vector<8xf32> to vector<8x1xf32>
    %107 = arith.subf %56, %98 : vector<8x1xf32>
    %108 = math.absf %107 : vector<8x1xf32>
    %cst_29 = arith.constant 0.000000e+00 : f32
    %109 = vector.broadcast %cst_29 : f32 to vector<8x1xf32>
    %110 = arith.subf %109, %108 : vector<8x1xf32>
    %111 = math.exp %110 : vector<8x1xf32>
    %cst_30 = arith.constant 5.000000e-01 : f32
    %112 = vector.broadcast %cst_30 : f32 to vector<8x1xf32>
    %113 = arith.mulf %112, %111 : vector<8x1xf32>
    %114 = tpu.reciprocal %106 : vector<8x1xf32> -> vector<8x1xf32>
    %115 = arith.mulf %113, %114 : vector<8x1xf32>
    %116 = arith.addf %96, %115 : vector<8x1xf32>
    %cst_31 = arith.constant 0.999999821 : f32
    %117 = vector.broadcast %cst_31 : f32 to vector<8x1xf32>
    %118 = arith.mulf %116, %117 : vector<8x1xf32>
    %cst_32 = arith.constant 1.000000e-07 : f32
    %119 = vector.broadcast %cst_32 : f32 to vector<8x1xf32>
    %120 = arith.addf %118, %119 : vector<8x1xf32>
    %121 = math.log %120 : vector<8x1xf32>
    %c8_i32 = arith.constant 8 : i32
    %122 = arith.muli %arg0, %c8_i32 : i32
    %123 = tpu.iota {dimensions = array<i32: 0>} : vector<8x1xi32>
    %124 = vector.broadcast %122 : i32 to vector<8x1xi32>
    %125 = arith.addi %124, %123 : vector<8x1xi32>
    %c8_i32_33 = arith.constant 8 : i32
    %126 = vector.broadcast %c8_i32_33 : i32 to vector<8x1xi32>
    %127 = arith.cmpi slt, %125, %126 : vector<8x1xi32>
    %128 = arith.extui %127 : vector<8x1xi1> to vector<8x1xi32>
    %129 = arith.sitofp %128 : vector<8x1xi32> to vector<8x1xf32>
    %130 = arith.mulf %121, %129 : vector<8x1xf32>
    %131 = vector.shape_cast %130 : vector<8x1xf32> to vector<1x8x1xf32>
    %cst_34 = arith.constant dense<0.000000e+00> : vector<1xf32>
    %132 = vector.multi_reduction <add>, %131, %cst_34 [1, 2] : vector<1x8x1xf32> to vector<1xf32>
    %133 = vector.shape_cast %132 : vector<1xf32> to vector<1x1x1xf32>
    %134 = vector.extract %133[0, 0, 0] : f32 from vector<1x1x1xf32>
    %cst_35 = arith.constant 0.000000e+00 : f32
    %135 = arith.subf %cst_35, %134 : f32
    %136 = vector.broadcast %135 : f32 to vector<1x8x128xf32>
    %c0_36 = arith.constant 0 : index
    %c0_37 = arith.constant 0 : index
    %c0_38 = arith.constant 0 : index
    %137 = vector.load %arg3[%c0_36, %c0_37, %c0_38] : memref<1x8x128xf32, #tpu.memory_space<vmem>>, vector<1x8x128xf32>
    tpu.vector_store %arg3[%c0_36, %c0_37, %c0_38], %136 {strides = array<i32>} : memref<1x8x128xf32, #tpu.memory_space<vmem>>, vector<1x8x128xf32>,
    return
  }
  func.func @transform_0(%arg0: i32) -> (i32, i32) {
    %c0_i32 = arith.constant 0 : i32
    %c0_i32_0 = arith.constant 0 : i32
    return %arg0, %c0_i32 : i32, i32
  }
  func.func @transform_1(%arg0: i32) -> (i32, i32) {
    %c0_i32 = arith.constant 0 : i32
    %c0_i32_0 = arith.constant 0 : i32
    return %arg0, %c0_i32 : i32, i32
  }
  func.func @transform_2(%arg0: i32) -> (i32, i32, i32) {
    %c0_i32 = arith.constant 0 : i32
    %c0_i32_0 = arith.constant 0 : i32
    %c0_i32_1 = arith.constant 0 : i32
    return %arg0, %c0_i32, %c0_i32_0 : i32, i32, i32
  }
}

</mosaic_0001>

<bundles_post_ra>
// kernel: tpu_custom_call.1
= control target key start
LH: loop header
LB: loop body
LE: loop exit
PB: predicated region body
PF: predicated region fallthrough
CT: control target
= control target key end

     0   :  { %s275_s0 = inlined_call_operand.vmem [shape: f32[8,128], index: 0, kind: input, shape index: {}]   ;;  %s276_s1 = inlined_call_operand.vmem [shape: s32[8,1], index: 1, kind: input, shape index: {}]   ;;  %s277_s2 = inlined_call_operand.hbm [shape: f32[1,8,128], index: 2, kind: output, shape index: {}]  }
   0x1   :  { %v246_v0 = vld [vmem:[%s275_s0] sm:$0xff] }
   0x2   :  { %7 = vsyncpa [#allocation3], 0  ;;  %23 = vmax.xlane.f32.xlu0 %v246_v0  ;;  %v13_v1 = vlaneseq  ;;  %v226_v21 = vmov 0   ;;  %v15_v26 = vld [vmem:[%s276_s1] sm:$0xff]  ;;  %v76_v27 = vmul.f32 2.0, %v246_v0  ;;  %vm142_vm7 = vcmask 7168  }
   0x3   :  { %174 = vset.pattern.permute.xlu1 %v226_v21  ;;  %175 = vset.pattern.permute.xlu0 %v226_v21  ;;  %s227_s1 = smov [#allocation2]  }
   0x4   :  { %v14_v2 = vand.u32 127, %v13_v1  ;;  %s162_s12 = sshll.u32 %s227_s1, 4  ;;  %s163_s12 = int_to_ptr.vmem [resolvable:$true] %s162_s12 }
   0x5   :  { %s202_s15 = scalar_lea.vmem %s163_s12, 128  ;;  %p207_p1 = scmp.lt.s32.totalorder %s163_s12, %s163_s12 }
   0x6   :  { %p203_p0 = scmp.ne.s32.totalorder %s163_s12, %s202_s15  ;;  %p208_p2 = scmp.lt.s32.totalorder %s202_s15, %s202_s15 }
   0x8   :  { %p209_p3 = por %p208_p2, %p207_p1 }
   0xa   :  { %p210_p4 = pnand %p209_p3, %p203_p0 }
  0x8f   :  { %v249_v3 = vpop.xlane.xlu0 %23 }
  0x90   :  { %vm25_vm0 = vcmp.eq.f32.partialorder %v246_v0, %v249_v3  ;;  %v112_v28 = vmul.f32 2.0, %v249_v3  ;;  %v65_v34 = vsub.f32 %v246_v0, %v249_v3 }
  0x91   :  { %v26_v4 = vsel %vm25_vm0, %v14_v2, 128 }
  0x92   :  { %v28_v5 = vshra.s32 %v26_v4, 16  ;;  %v27_v7 = vand.u32 65535, %v26_v4  ;;  %v113_v29 = vsub.f32 %v76_v27, %v112_v28  ;;  %v66_v36 = vmul.f32 1.442695, %v65_v34 }
  0x94   :  { %v30_v6 = vcvt.s32.f32 %v28_v5  ;;  %v29_v9 = vcvt.s32.f32 %v27_v7  ;;  %v114_v30 = vand.u32 2147483647, %v113_v29 }
  0x96   :  { %31 = vmin.xlane.f32.xlu0 %v30_v6  ;;  %v115_v31 = vsub.f32 0.0, %v114_v30 }
  0x98   :  { %v116_v32 = vmul.f32 1.442695, %v115_v31 }
  0x9a   :  { %176 = vpow2.f32 %v116_v32 }
  0x9b   :  { %178 = vpow2.f32 %v66_v36 }
  0xa4   :  { %v177_v33 = vpop.eup %176 }
  0xa5   :  { %v179_v44 = vpop.eup %178 }
 0x123   :  { %v32_v8 = vpop.xlane.xlu0 %31 }
 0x124   :  { %vm33_vm1 = vcmp.eq.f32.partialorder %v30_v6, %v32_v8  ;;  %v38_v11 = vcvt.f32.s32 %v32_v8 }
 0x125   :  { %v34_v10 = vsel %vm33_vm1, %v29_v9, inf }
 0x126   :  { %35 = vmin.xlane.f32.xlu1 %v34_v10  ;;  %v39_v13 = vshll.u32 %v38_v11, 16 }
 0x1b3   :  { %v36_v12 = vpop.xlane.xlu1 %35 }
 0x1b4   :  { %v37_v14 = vcvt.f32.s32 %v36_v12 }
 0x1b6   :  { %v40_v15 = vadd.s32 %v39_v13, %v37_v14 }
 0x1b8   :  { %vm41_vm2 = vcmp.eq.s32.totalorder %v14_v2, %v40_v15 }
 0x1b9   :  { %v42_v16 = vsel %vm41_vm2, -inf, %v246_v0 }
 0x1ba   :  { %43 = vmax.xlane.f32.xlu1 %v42_v16 }
 0x247   :  { %v44_v17 = vpop.xlane.xlu1 %43 }
 0x248   :  { %vm45_vm3 = vcmp.eq.f32.partialorder %v42_v16, %v44_v17  ;;  %v95_v45 = vmul.f32 2.0, %v44_v17 }
 0x249   :  { %v46_v18 = vsel %vm45_vm3, %v14_v2, 128 }
 0x24a   :  { %v48_v19 = vshra.s32 %v46_v18, 16  ;;  %v47_v22 = vand.u32 65535, %v46_v18  ;;  %v96_v46 = vsub.f32 %v76_v27, %v95_v45 }
 0x24c   :  { %v50_v20 = vcvt.s32.f32 %v48_v19  ;;  %v49_v24 = vcvt.s32.f32 %v47_v22  ;;  %v97_v49 = vand.u32 2147483647, %v96_v46 }
 0x24e   :  { %51 = vmin.xlane.f32.xlu0 %v50_v20  ;;  %v98_v52 = vsub.f32 0.0, %v97_v49 }
 0x250   :  { %v99_v55 = vmul.f32 1.442695, %v98_v52 }
 0x2db   :  { %v52_v23 = vpop.xlane.xlu0 %51 }
 0x2dc   :  { %vm53_vm4 = vcmp.eq.f32.partialorder %v50_v20, %v52_v23  ;;  %v58_v35 = vcvt.f32.s32 %v52_v23 }
 0x2dd   :  { %v54_v25 = vsel %vm53_vm4, %v49_v24, inf }
 0x2de   :  { %55 = vmin.xlane.f32.xlu1 %v54_v25  ;;  %v59_v38 = vshll.u32 %v58_v35, 16 }
 0x2ef   :  { %17 = vperm.xlu1 %174, %v15_v26  }
 0x313   :  { %118 = vadd.xlane.f32.xlu1 %v177_v33 }
 0x36b   :  { %v56_v37 = vpop.xlane.xlu1 %55 }
 0x36c   :  { %v57_v39 = vcvt.f32.s32 %v56_v37 }
 0x36e   :  { %v60_v40 = vadd.s32 %v59_v38, %v57_v39 }
 0x36f   :  { %v18_v41 = vpop.permute.xlu1 %17 }
 0x370   :  { %vm61_vm5 = vcmp.eq.s32.totalorder %v14_v2, %v60_v40  ;;  %vm19_vm6 = vcmp.eq.s32.totalorder %v14_v2, %v18_v41 }
 0x371   :  { %v62_v42 = vsel %vm61_vm5, -inf, %v42_v16  ;;  %v20_v43 = vsel %vm19_vm6, %v246_v0, 0.0 }
 0x372   :  { %63 = vmax.xlane.f32.xlu0 %v62_v42 }
 0x376   :  { %21 = vadd.xlane.f32.xlu0 %v20_v43 }
 0x37a   :  { %68 = vadd.xlane.f32.xlu0 %v179_v44 }
 0x3a0   :  { %v119_v13 = vpop.xlane.xlu1 %118 }
 0x3ff   :  { %v64_v47 = vpop.xlane.xlu0 %63 }
 0x400   :  { %v78_v48 = vmul.f32 2.0, %v64_v47 }
 0x402   :  { %v79_v50 = vsub.f32 %v76_v27, %v78_v48 }
 0x403   :  { %v22_v58 = vpop.xlane.xlu0 %21 }
 0x404   :  { %v80_v51 = vand.u32 2147483647, %v79_v50  ;;  %v77_v59 = vmul.f32 2.0, %v22_v58  ;;  %v70_v1 = vsub.f32 %v22_v58, %v249_v3 }
 0x406   :  { %v81_v53 = vsub.f32 0.0, %v80_v51  ;;  %v86_v60 = vsub.f32 %v77_v59, %v78_v48  ;;  %v103_v61 = vsub.f32 %v77_v59, %v95_v45  ;;  %v120_v62 = vsub.f32 %v77_v59, %v112_v28 }
 0x407   :  { %v71_v6 = vmul.f32 1.442695, %v70_v1  ;;  %v69_v11 = vpop.xlane.xlu0 %68 }
 0x408   :  { %v82_v54 = vmul.f32 1.442695, %v81_v53  ;;  %v87_v63 = vand.u32 2147483647, %v86_v60  ;;  %v104_v0 = vand.u32 2147483647, %v103_v61 }
 0x409   :  { %v121_v2 = vand.u32 2147483647, %v120_v62 }
 0x40a   :  { %180 = vpow2.f32 %v82_v54  ;;  %v88_v4 = vsub.f32 0.0, %v87_v63  ;;  %v105_v5 = vsub.f32 0.0, %v104_v0 }
 0x40b   :  { %182 = vpow2.f32 %v99_v55  ;;  %v122_v7 = vsub.f32 0.0, %v121_v2 }
 0x40c   :  { %v89_v8 = vmul.f32 1.442695, %v88_v4  ;;  %v106_v9 = vmul.f32 1.442695, %v105_v5  ;;  %184 = vpow2.f32 %v71_v6 }
 0x40d   :  { %v123_v10 = vmul.f32 1.442695, %v122_v7 }
 0x40e   :  { %186 = vpow2.f32 %v89_v8 }
 0x40f   :  { %188 = vpow2.f32 %v106_v9 }
 0x410   :  { %190 = vpow2.f32 %v123_v10 }
 0x414   :  { %v181_v56 = vpop.eup %180 }
 0x415   :  { %84 = vadd.xlane.f32.xlu0 %v181_v56  ;;  %v183_v57 = vpop.eup %182 }
 0x416   :  { %v185_v3 = vpop.eup %184 }
 0x417   :  { %v73_v18 = vmul.f32 0.5, %v185_v3 }
 0x418   :  { %v187_v15 = vpop.eup %186 }
 0x419   :  { %101 = vadd.xlane.f32.xlu0 %v183_v57  ;;  %v189_v16 = vpop.eup %188  ;;  %v91_v19 = vmul.f32 0.2, %v187_v15 }
 0x41a   :  { %v191_v17 = vpop.eup %190  ;;  %v108_v23 = vmul.f32 0.5, %v189_v16 }
 0x41b   :  { %v125_v25 = vmul.f32 0.5, %v191_v17 }
 0x4a2   :  { %v85_v12 = vpop.xlane.xlu0 %84 }
 0x4a3   :  { %192 = vrcp.f32 %v85_v12 }
 0x4a4   :  { %194 = vrcp.f32 %v69_v11 }
 0x4a6   :  { %v102_v14 = vpop.xlane.xlu0 %101 }
 0x4a7   :  { %196 = vrcp.f32 %v102_v14 }
 0x4a8   :  { %198 = vrcp.f32 %v119_v13 }
 0x4ad   :  { %v193_v20 = vpop.eup %192 }
 0x4ae   :  { %v93_v21 = vmul.f32 %v193_v20, %v91_v19  ;;  %v195_v22 = vpop.eup %194 }
 0x4af   :  { %v75_v24 = vmul.f32 %v195_v22, %v73_v18 }
 0x4b1   :  { %v197_v26 = vpop.eup %196  ;;  %v94_v27 = vadd.f32 %v93_v21, %v75_v24 }
 0x4b2   :  { %v110_v28 = vmul.f32 %v197_v26, %v108_v23  ;;  %v199_v29 = vpop.eup %198 }
 0x4b3   :  { %v127_v31 = vmul.f32 %v199_v29, %v125_v25 }
 0x4b4   :  { %v111_v30 = vadd.f32 %v110_v28, %v94_v27 }
 0x4b6   :  { %v128_v32 = vadd.f32 %v127_v31, %v111_v30 }
 0x4b8   :  { %v129_v33 = vmul.f32 0.9999998, %v128_v32 }
 0x4ba   :  { %v130_v34 = vadd.f32 1e-07, %v129_v33 }
 0x4bc   :  { %200 = vlog2.f32 %v130_v34 }
 0x4c6   :  { %v201_v35 = vpop.eup %200 }
 0x4c7   :  { %v132_v36 = vmul.f32 0.6931472, %v201_v35 }
 0x4c9   :  { %v143_v37 = vsel %vm142_vm7, %v132_v36, 0.0 }
 0x4ca   :  { %144 = vadd.xlane.f32.xlu0 %v143_v37 }
 0x557   :  { %v145_v38 = vpop.xlane.xlu0 %144 }
 0x558   :  { %v146_v39 = vrot.slane %v145_v38, 4 }
 0x55a   :  { %v147_v40 = vadd.f32 %v146_v39, %v145_v38 }
 0x55c   :  { %v148_v41 = vrot.slane %v147_v40, 2 }
 0x55e   :  { %v149_v42 = vadd.f32 %v148_v41, %v147_v40 }
 0x560   :  { %v150_v43 = vrot.slane %v149_v42, 1 }
 0x562   :  { %v151_v44 = vadd.f32 %v150_v43, %v149_v42 }
 0x564   :  { %170 = vpush %v151_v44 }
 0x595   :  { %s171_s13 = spop %170 }
 0x596   :  { %s153_s14 = ssub.f32 0.0, %s171_s13 }
 0x598   :  { %v154_v45 = vstv %s153_s14 }
 0x599   :  { %155 = vst [vmem:[#allocation2] sm:$0xff] %v154_v45 }
 0x59a   :  { %213 = shalt.err (!%p210_p4)
}
 0x59b   :  { %s214_s18 = scalar_lea.hbm %s277_s2, 128 }
 0x59c   :  { %p215_p5 = scmp.ne.s32.totalorder %s277_s2, %s214_s18  ;;  %p218_p6 = scmp.lt.u32.totalorder %s214_s18, %s277_s2 }
 0x59e   :  { %p220_p7 = pnand %p218_p6, %p215_p5 }
 0x5a0   :  { %223 = shalt.err (!%p220_p7)
}
 0x5a1   :  { %165 = dma.vmem_to_hbm [thread:$0]  %s163_s12, 128, %s277_s2, [#allocation3]  }
 0x5a2   :  { %224 = dma.done.wait [#allocation3], 128  }
 0x5a3   :  { %225 = vsyncadd [#allocation3], 4294967168 }
 0x5a4   :  { %169 = vsyncpa [#allocation3], 1 }

</bundles_post_ra>
